<compile_context>
chip_gen: v5e
topology: v5e:2x2
jax: 0.10.0
libtpu: 0.0.40
codegen_flags: <defaults>
</compile_context>

<pallas_src>
import functools
import math

import jax
import jax.numpy as jnp
from jax import lax
from jax.experimental import pallas as pl
from jax.experimental.pallas import tpu as pltpu


# ----------------------------------------------------------------------------
# Pallas kernel: whole cross-attention sublayer for one batch element
# ----------------------------------------------------------------------------
def _cross_attn_kernel(
    x_ref,        # (1, Tq, E)   hidden_states (query side)
    enc_ref,      # (1, Tk, E)   encoder_hidden_states (key/value side)
    bias_ref,     # (1, 1, Tk)   additive mask bias (0 = keep, -1e9 = masked)
    wq_ref, bq_ref,       # (E, E), (1, E)
    wkv_ref, bkv_ref,     # (E, 2E), (1, 2E)   fused K|V projection
    wo_ref, bo_ref,       # (E, E), (1, E)
    gamma_ref, beta_ref,  # (1, E), (1, E)
    out_ref,      # (1, Tq, E)
    *maybe_attn_ref,      # optionally (1, H, Tq, Tk)
    num_heads: int, pre_layernorm: bool, ln_eps: float, mxu_dtype,
):
    attn_ref = maybe_attn_ref[0] if maybe_attn_ref else None

    x = x_ref[0].astype(jnp.float32)          # (Tq, E)
    enc = enc_ref[0]                          # (Tk, E)
    bias = bias_ref[0].astype(jnp.float32)    # (1, Tk)

    gamma = gamma_ref[...].astype(jnp.float32)  # (1, E)
    beta = beta_ref[...].astype(jnp.float32)    # (1, E)

    Tq, E = x.shape
    Tk = enc.shape[0]
    d_head = E // num_heads
    scale = 1.0 / math.sqrt(d_head)

    def layer_norm(z):
        mu = jnp.mean(z, axis=-1, keepdims=True)
        var = jnp.mean((z - mu) ** 2, axis=-1, keepdims=True)
        return (z - mu) * lax.rsqrt(var + ln_eps) * gamma + beta

    attn_in = layer_norm(x) if pre_layernorm else x

    # ---- Projections (MXU, bf16 operands, f32 accumulation) ------------------
    q = jnp.dot(attn_in.astype(mxu_dtype), wq_ref[...].astype(mxu_dtype),
                preferred_element_type=jnp.float32) + bq_ref[...]
    q = (q * scale).astype(mxu_dtype)                       # scale folded in once

    kv = jnp.dot(enc.astype(mxu_dtype), wkv_ref[...].astype(mxu_dtype),
                 preferred_element_type=jnp.float32) + bkv_ref[...]   # (Tk, 2E)
    k = kv[:, :E].astype(mxu_dtype)
    v = kv[:, E:].astype(mxu_dtype)
    wo_m = wo_ref[...].astype(mxu_dtype)

    # Additive mask bias, broadcast once (head-invariant).
    bias_b = jnp.broadcast_to(bias, (Tq, Tk))

    # ---- Per-head attention; accumulate the output projection ----------------
    # NOTE: at real configs d_head should be a multiple of the lane width (128);
    # for tiny toy d_head the lane slices below still lower correctly.
    o = jnp.zeros((Tq, E), jnp.float32)
    for h in range(num_heads):                               # static unrolled head loop
        sl = slice(h * d_head, (h + 1) * d_head)

        scores = lax.dot_general(
            q[:, sl], k[:, sl],
            dimension_numbers=(((1,), (1,)), ((), ())),
            preferred_element_type=jnp.float32,
        ) + bias_b                                           # (Tq, Tk)

        # numerically stable softmax over keys
        scores = scores - jnp.max(scores, axis=-1, keepdims=True)
        p = jnp.exp(scores)
        p = p * pl.reciprocal(jnp.sum(p, axis=-1, keepdims=True), approx=True)

        if attn_ref is not None:
            attn_ref[0, h] = p.astype(attn_ref.dtype)

        ctx_h = jnp.dot(p.astype(mxu_dtype), v[:, sl],
                        preferred_element_type=jnp.float32)  # (Tq, d_head)
        # Accumulate output projection per head (no lane concatenate).
        o = o + jnp.dot(ctx_h.astype(mxu_dtype), wo_m[sl, :],
                        preferred_element_type=jnp.float32)  # (Tq, E)

    o = o + bo_ref[...]

    # Residual (+ dropout == identity in eval mode) and post-layernorm.
    # TODO(synk): dropout is a no-op (inference semantics); no RNG emitted.
    res = x + o
    y = res if pre_layernorm else layer_norm(res)
    out_ref[0] = y.astype(out_ref.dtype)


# ----------------------------------------------------------------------------
# Wrapper
# ----------------------------------------------------------------------------
def cross_attention_sublayer(
    hidden_states,            # (B, Tq, E)
    encoder_hidden_states,    # (B, Tk, E)
    encoder_attention_mask,   # (B, 1, Tk)  (1 = keep, 0 = mask)
    params,                   # dict of weights
    *, num_heads: int, pre_layernorm: bool = False, ln_eps: float = 1e-5,
    mxu_dtype=jnp.bfloat16, attn_dtype=jnp.float32, return_attention: bool = True,
):
    B, Tq, E = hidden_states.shape
    Tk = encoder_hidden_states.shape[1]
    H = num_heads

    # Precompute the additive mask bias outside the kernel (removes per-head
    # compare+select from the VPU path).
    mask_bias = jnp.where(encoder_attention_mask == 0,
                          jnp.float32(-1e9), jnp.float32(0.0))

    # Fused K|V projection weights.
    wkv = jnp.concatenate([params["wk"], params["wv"]], axis=1)   # (E, 2E)
    bkv = jnp.concatenate([params["bk"], params["bv"]], axis=1)   # (1, 2E)

    kernel = functools.partial(
        _cross_attn_kernel,
        num_heads=num_heads,
        pre_layernorm=pre_layernorm,
        ln_eps=ln_eps,
        mxu_dtype=mxu_dtype,
    )

    def full(shape):
        return pl.BlockSpec(shape, lambda b: (0,) * len(shape))

    in_specs = [
        pl.BlockSpec((1, Tq, E), lambda b: (b, 0, 0)),   # hidden_states
        pl.BlockSpec((1, Tk, E), lambda b: (b, 0, 0)),   # encoder_hidden_states
        pl.BlockSpec((1, 1, Tk), lambda b: (b, 0, 0)),   # additive mask bias
        full((E, E)), full((1, E)),                      # Wq, bq
        full((E, 2 * E)), full((1, 2 * E)),              # W[k|v], b[k|v]
        full((E, E)), full((1, E)),                      # Wo, bo
        full((1, E)), full((1, E)),                      # gamma, beta
    ]

    out_specs = [pl.BlockSpec((1, Tq, E), lambda b: (b, 0, 0))]
    out_shapes = [jax.ShapeDtypeStruct((B, Tq, E), hidden_states.dtype)]
    if return_attention:
        out_specs.append(pl.BlockSpec((1, H, Tq, Tk), lambda b: (b, 0, 0, 0)))
        out_shapes.append(jax.ShapeDtypeStruct((B, H, Tq, Tk), attn_dtype))

    grid_spec = pltpu.PrefetchScalarGridSpec(
        num_scalar_prefetch=0,
        grid=(B,),
        in_specs=in_specs,
        out_specs=out_specs,
    )

    results = pl.pallas_call(
        kernel,
        grid_spec=grid_spec,
        out_shape=tuple(out_shapes),
        compiler_params=pltpu.CompilerParams(
            # Batch elements are independent -> shard across TCs on v7x; neutral on v5e/v6e.
            dimension_semantics=("parallel",),
        ),
    )(
        hidden_states, encoder_hidden_states, mask_bias,
        params["wq"], params["bq"],
        wkv, bkv,
        params["wo"], params["bo"],
        params["gamma"], params["beta"],
    )

    if return_attention:
        out, attn = results
        return out, attn
    return results[0], None


# ----------------------------------------------------------------------------
# Pure-JAX reference (mirrors the PyTorch forward, eval mode, f32 everywhere)
# ----------------------------------------------------------------------------
def reference(hidden, enc, mask, params, *, num_heads, pre_layernorm, ln_eps=1e-5):
    B, Tq, E = hidden.shape
    Tk = enc.shape[1]
    d = E // num_heads

    def ln(z):
        mu = jnp.mean(z, axis=-1, keepdims=True)
        var = jnp.mean((z - mu) ** 2, axis=-1, keepdims=True)
        return (z - mu) / jnp.sqrt(var + ln_eps) * params["gamma"][0] + params["beta"][0]

    x = ln(hidden) if pre_layernorm else hidden
    q = x @ params["wq"] + params["bq"][0]
    k = enc @ params["wk"] + params["bk"][0]
    v = enc @ params["wv"] + params["bv"][0]

    q = q.reshape(B, Tq, num_heads, d).transpose(0, 2, 1, 3)
    k = k.reshape(B, Tk, num_heads, d).transpose(0, 2, 1, 3)
    v = v.reshape(B, Tk, num_heads, d).transpose(0, 2, 1, 3)

    scores = jnp.einsum("bhtd,bhsd->bhts", q, k) / math.sqrt(d)
    bmask = mask[:, :, None, :]                    # (B, 1, 1, Tk)
    scores = jnp.where(bmask == 0, -1e9, scores)
    attn = jax.nn.softmax(scores, axis=-1)
    ctx = jnp.einsum("bhts,bhsd->bhtd", attn, v)
    ctx = ctx.transpose(0, 2, 1, 3).reshape(B, Tq, E)
    o = ctx @ params["wo"] + params["bo"][0]
    res = hidden + o
    y = res if pre_layernorm else ln(res)
    return y, attn


# ----------------------------------------------------------------------------
# Main
# ----------------------------------------------------------------------------
if __name__ == "__main__":
    B, Tq, Tk, E, H = 2, 8, 12, 32, 4
    pre_layernorm = False

    key = jax.random.PRNGKey(0)
    keys = jax.random.split(key, 12)

    hidden = jax.random.normal(keys[0], (B, Tq, E), dtype=jnp.float32)
    enc = jax.random.normal(keys[1], (B, Tk, E), dtype=jnp.float32)

    # mask: batch 0 fully visible, batch 1 masks the last 4 encoder positions
    mask = jnp.ones((B, 1, Tk), dtype=jnp.float32)
    mask = mask.at[1, 0, Tk - 4:].set(0.0)

    s = 0.05
    params = {
        "wq": s * jax.random.normal(keys[2], (E, E), jnp.float32),
        "bq": s * jax.random.normal(keys[3], (1, E), jnp.float32),
        "wk": s * jax.random.normal(keys[4], (E, E), jnp.float32),
        "bk": s * jax.random.normal(keys[5], (1, E), jnp.float32),
        "wv": s * jax.random.normal(keys[6], (E, E), jnp.float32),
        "bv": s * jax.random.normal(keys[7], (1, E), jnp.float32),
        "wo": s * jax.random.normal(keys[8], (E, E), jnp.float32),
        "bo": s * jax.random.normal(keys[9], (1, E), jnp.float32),
        "gamma": jnp.ones((1, E), jnp.float32),
        "beta": jnp.zeros((1, E), jnp.float32),
    }

    out, attn = cross_attention_sublayer(
        hidden, enc, mask, params,
        num_heads=H, pre_layernorm=pre_layernorm,
    )
    out = jax.block_until_ready(out)
    attn = jax.block_until_ready(attn)

    ref_out, ref_attn = reference(
        hidden, enc, mask, params,
        num_heads=H, pre_layernorm=pre_layernorm,
    )

    assert out.shape == (B, Tq, E)
    assert attn.shape == (B, H, Tq, Tk)
    # bf16 MXU operands + approx reciprocal -> slightly looser tolerances than pure f32.
    assert jnp.allclose(out, ref_out, atol=1e-2, rtol=1e-2), "output mismatch"
    assert jnp.allclose(attn, ref_attn, atol=3e-3, rtol=1e-2), "attention mismatch"

    # Fast path: attention probabilities dropped entirely (no HBM writeback for them).
    out_noattn, attn_none = cross_attention_sublayer(
        hidden, enc, mask, params,
        num_heads=H, pre_layernorm=pre_layernorm, return_attention=False,
    )
    out_noattn = jax.block_until_ready(out_noattn)
    assert attn_none is None
    assert jnp.allclose(out_noattn, ref_out, atol=1e-2, rtol=1e-2), "no-attn output mismatch"

    print("KERNEL_OK")
</pallas_src>

<mosaic_0001>
module attributes {stable_mosaic.version = 11 : i64} {
  func.func @_cross_attn_kernel(%arg0: i32, %arg1: memref<1x8x32xf32, #tpu.memory_space<vmem>>, %arg2: memref<1x12x32xf32, #tpu.memory_space<vmem>>, %arg3: memref<1x1x12xf32, #tpu.memory_space<vmem>>, %arg4: memref<32x32xf32, #tpu.memory_space<vmem>>, %arg5: memref<1x32xf32, #tpu.memory_space<vmem>>, %arg6: memref<32x64xf32, #tpu.memory_space<vmem>>, %arg7: memref<1x64xf32, #tpu.memory_space<vmem>>, %arg8: memref<32x32xf32, #tpu.memory_space<vmem>>, %arg9: memref<1x32xf32, #tpu.memory_space<vmem>>, %arg10: memref<1x32xf32, #tpu.memory_space<vmem>>, %arg11: memref<1x32xf32, #tpu.memory_space<vmem>>, %arg12: memref<1x8x32xf32, #tpu.memory_space<vmem>>, %arg13: memref<1x4x8x12xf32, #tpu.memory_space<vmem>>) attributes {dimension_semantics = [#tpu.dimension_semantics<parallel>], iteration_bounds = array<i64: 2>, scalar_prefetch = 0 : i64, scratch_operands = 0 : i64, tpu.core_type = #tpu.core_type<tc>, window_params = [{transform_indices = @transform_0, window_bounds = array<i64: 1, 8, 32>}, {transform_indices = @transform_1, window_bounds = array<i64: 1, 12, 32>}, {transform_indices = @transform_2, window_bounds = array<i64: 1, 1, 12>}, {pipeline_mode = #tpu.pipeline_mode<synchronous>, transform_indices = @transform_3, window_bounds = array<i64: 32, 32>}, {pipeline_mode = #tpu.pipeline_mode<synchronous>, transform_indices = @transform_4, window_bounds = array<i64: 1, 32>}, {pipeline_mode = #tpu.pipeline_mode<synchronous>, transform_indices = @transform_5, window_bounds = array<i64: 32, 64>}, {pipeline_mode = #tpu.pipeline_mode<synchronous>, transform_indices = @transform_6, window_bounds = array<i64: 1, 64>}, {pipeline_mode = #tpu.pipeline_mode<synchronous>, transform_indices = @transform_7, window_bounds = array<i64: 32, 32>}, {pipeline_mode = #tpu.pipeline_mode<synchronous>, transform_indices = @transform_8, window_bounds = array<i64: 1, 32>}, {pipeline_mode = #tpu.pipeline_mode<synchronous>, transform_indices = @transform_9, window_bounds = array<i64: 1, 32>}, {pipeline_mode = #tpu.pipeline_mode<synchronous>, transform_indices = @transform_10, window_bounds = array<i64: 1, 32>}, {transform_indices = @transform_11, window_bounds = array<i64: 1, 8, 32>}, {transform_indices = @transform_12, window_bounds = array<i64: 1, 4, 8, 12>}]} {
    %c0 = arith.constant 0 : index
    %c0_0 = arith.constant 0 : index
    %c0_1 = arith.constant 0 : index
    %0 = vector.load %arg1[%c0, %c0_0, %c0_1] : memref<1x8x32xf32, #tpu.memory_space<vmem>>, vector<1x8x32xf32>
    %1 = vector.shape_cast %0 : vector<1x8x32xf32> to vector<8x32xf32>
    %c0_2 = arith.constant 0 : index
    %c0_3 = arith.constant 0 : index
    %c0_4 = arith.constant 0 : index
    %2 = vector.load %arg2[%c0_2, %c0_3, %c0_4] : memref<1x12x32xf32, #tpu.memory_space<vmem>>, vector<1x12x32xf32>
    %3 = vector.shape_cast %2 : vector<1x12x32xf32> to vector<12x32xf32>
    %c0_5 = arith.constant 0 : index
    %c0_6 = arith.constant 0 : index
    %c0_7 = arith.constant 0 : index
    %4 = vector.load %arg3[%c0_5, %c0_6, %c0_7] : memref<1x1x12xf32, #tpu.memory_space<vmem>>, vector<1x1x12xf32>
    %5 = vector.shape_cast %4 : vector<1x1x12xf32> to vector<1x12xf32>
    %c0_8 = arith.constant 0 : index
    %c0_9 = arith.constant 0 : index
    %6 = vector.load %arg10[%c0_8, %c0_9] : memref<1x32xf32, #tpu.memory_space<vmem>>, vector<1x32xf32>
    %c0_10 = arith.constant 0 : index
    %c0_11 = arith.constant 0 : index
    %7 = vector.load %arg11[%c0_10, %c0_11] : memref<1x32xf32, #tpu.memory_space<vmem>>, vector<1x32xf32>
    %8 = arith.truncf %1 : vector<8x32xf32> to vector<8x32xbf16>
    %c0_12 = arith.constant 0 : index
    %c0_13 = arith.constant 0 : index
    %9 = vector.load %arg4[%c0_12, %c0_13] : memref<32x32xf32, #tpu.memory_space<vmem>>, vector<32x32xf32>
    %10 = arith.truncf %9 : vector<32x32xf32> to vector<32x32xbf16>
    %cst = arith.constant dense<0.000000e+00> : vector<8x32xf32>
    %11 = tpu.matmul %8, %10, %cst {dimension_numbers = #tpu.dot_dimension_numbers<[1], [0], [0], [1], [0, 0, 1, 1], [], []>} : vector<8x32xbf16>, vector<32x32xbf16>, vector<8x32xf32> -> vector<8x32xf32>
    %c0_14 = arith.constant 0 : index
    %c0_15 = arith.constant 0 : index
    %12 = vector.load %arg5[%c0_14, %c0_15] : memref<1x32xf32, #tpu.memory_space<vmem>>, vector<1x32xf32>
    %13 = vector.broadcast %12 : vector<1x32xf32> to vector<8x32xf32>
    %14 = arith.addf %11, %13 : vector<8x32xf32>
    %cst_16 = arith.constant 0.353553385 : f32
    %15 = vector.broadcast %cst_16 : f32 to vector<8x32xf32>
    %16 = arith.mulf %14, %15 : vector<8x32xf32>
    %17 = arith.truncf %16 : vector<8x32xf32> to vector<8x32xbf16>
    %18 = arith.truncf %3 : vector<12x32xf32> to vector<12x32xbf16>
    %c0_17 = arith.constant 0 : index
    %c0_18 = arith.constant 0 : index
    %19 = vector.load %arg6[%c0_17, %c0_18] : memref<32x64xf32, #tpu.memory_space<vmem>>, vector<32x64xf32>
    %20 = arith.truncf %19 : vector<32x64xf32> to vector<32x64xbf16>
    %cst_19 = arith.constant dense<0.000000e+00> : vector<12x64xf32>
    %21 = tpu.matmul %18, %20, %cst_19 {dimension_numbers = #tpu.dot_dimension_numbers<[1], [0], [0], [1], [0, 0, 1, 1], [], []>} : vector<12x32xbf16>, vector<32x64xbf16>, vector<12x64xf32> -> vector<12x64xf32>
    %c0_20 = arith.constant 0 : index
    %c0_21 = arith.constant 0 : index
    %22 = vector.load %arg7[%c0_20, %c0_21] : memref<1x64xf32, #tpu.memory_space<vmem>>, vector<1x64xf32>
    %23 = vector.broadcast %22 : vector<1x64xf32> to vector<12x64xf32>
    %24 = arith.addf %21, %23 : vector<12x64xf32>
    %25 = vector.extract_strided_slice %24 {offsets = [0, 0], sizes = [12, 32], strides = [1, 1]} : vector<12x64xf32> to vector<12x32xf32>
    %26 = arith.truncf %25 : vector<12x32xf32> to vector<12x32xbf16>
    %27 = vector.extract_strided_slice %24 {offsets = [0, 32], sizes = [12, 32], strides = [1, 1]} : vector<12x64xf32> to vector<12x32xf32>
    %28 = arith.truncf %27 : vector<12x32xf32> to vector<12x32xbf16>
    %c0_22 = arith.constant 0 : index
    %c0_23 = arith.constant 0 : index
    %29 = vector.load %arg8[%c0_22, %c0_23] : memref<32x32xf32, #tpu.memory_space<vmem>>, vector<32x32xf32>
    %30 = arith.truncf %29 : vector<32x32xf32> to vector<32x32xbf16>
    %31 = vector.shape_cast %5 : vector<1x12xf32> to vector<1x12xf32>
    %32 = vector.broadcast %31 : vector<1x12xf32> to vector<8x12xf32>
    %cst_24 = arith.constant 0.000000e+00 : f32
    %33 = vector.broadcast %cst_24 : f32 to vector<8x32xf32>
    %34 = vector.extract_strided_slice %17 {offsets = [0, 0], sizes = [8, 8], strides = [1, 1]} : vector<8x32xbf16> to vector<8x8xbf16>
    %35 = vector.extract_strided_slice %26 {offsets = [0, 0], sizes = [12, 8], strides = [1, 1]} : vector<12x32xbf16> to vector<12x8xbf16>
    %cst_25 = arith.constant dense<0.000000e+00> : vector<8x12xf32>
    %36 = tpu.matmul %34, %35, %cst_25 {dimension_numbers = #tpu.dot_dimension_numbers<[1], [1], [0], [0], [0, 0, 1, 0], [], []>} : vector<8x8xbf16>, vector<12x8xbf16>, vector<8x12xf32> -> vector<8x12xf32>
    %37 = arith.addf %36, %32 : vector<8x12xf32>
    %cst_26 = arith.constant dense<0xFF800000> : vector<8xf32>
    %38 = vector.multi_reduction <maximumf>, %37, %cst_26 [1] : vector<8x12xf32> to vector<8xf32>
    %39 = vector.shape_cast %38 : vector<8xf32> to vector<8x1xf32>
    %40 = vector.broadcast %39 : vector<8x1xf32> to vector<8x12xf32>
    %41 = arith.subf %37, %40 : vector<8x12xf32>
    %42 = math.exp %41 : vector<8x12xf32>
    %cst_27 = arith.constant dense<0.000000e+00> : vector<8xf32>
    %43 = vector.multi_reduction <add>, %42, %cst_27 [1] : vector<8x12xf32> to vector<8xf32>
    %44 = vector.shape_cast %43 : vector<8xf32> to vector<8x1xf32>
    %45 = tpu.reciprocal %44 {approx = true} : vector<8x1xf32> -> vector<8x1xf32>
    %46 = vector.broadcast %45 : vector<8x1xf32> to vector<8x12xf32>
    %47 = arith.mulf %42, %46 : vector<8x12xf32>
    %c0_28 = arith.constant 0 : index
    %c0_29 = arith.constant 0 : index
    %c0_30 = arith.constant 0 : index
    %c0_31 = arith.constant 0 : index
    %48 = vector.load %arg13[%c0_28, %c0_29, %c0_30, %c0_31] : memref<1x4x8x12xf32, #tpu.memory_space<vmem>>, vector<1x1x8x12xf32>
    %49 = vector.shape_cast %48 : vector<1x1x8x12xf32> to vector<8x12xf32>
    %50 = vector.shape_cast %47 : vector<8x12xf32> to vector<1x1x8x12xf32>
    tpu.vector_store %arg13[%c0_28, %c0_29, %c0_30, %c0_31], %50 {strides = array<i32>} : memref<1x4x8x12xf32, #tpu.memory_space<vmem>>, vector<1x1x8x12xf32>,
    %51 = arith.truncf %47 : vector<8x12xf32> to vector<8x12xbf16>
    %52 = vector.extract_strided_slice %28 {offsets = [0, 0], sizes = [12, 8], strides = [1, 1]} : vector<12x32xbf16> to vector<12x8xbf16>
    %cst_32 = arith.constant dense<0.000000e+00> : vector<8x8xf32>
    %53 = tpu.matmul %51, %52, %cst_32 {dimension_numbers = #tpu.dot_dimension_numbers<[1], [0], [0], [1], [0, 0, 1, 1], [], []>} : vector<8x12xbf16>, vector<12x8xbf16>, vector<8x8xf32> -> vector<8x8xf32>
    %54 = arith.truncf %53 : vector<8x8xf32> to vector<8x8xbf16>
    %55 = vector.extract_strided_slice %30 {offsets = [0, 0], sizes = [8, 32], strides = [1, 1]} : vector<32x32xbf16> to vector<8x32xbf16>
    %cst_33 = arith.constant dense<0.000000e+00> : vector<8x32xf32>
    %56 = tpu.matmul %54, %55, %cst_33 {dimension_numbers = #tpu.dot_dimension_numbers<[1], [0], [0], [1], [0, 0, 1, 1], [], []>} : vector<8x8xbf16>, vector<8x32xbf16>, vector<8x32xf32> -> vector<8x32xf32>
    %57 = arith.addf %33, %56 : vector<8x32xf32>
    %58 = vector.extract_strided_slice %17 {offsets = [0, 8], sizes = [8, 8], strides = [1, 1]} : vector<8x32xbf16> to vector<8x8xbf16>
    %59 = vector.extract_strided_slice %26 {offsets = [0, 8], sizes = [12, 8], strides = [1, 1]} : vector<12x32xbf16> to vector<12x8xbf16>
    %cst_34 = arith.constant dense<0.000000e+00> : vector<8x12xf32>
    %60 = tpu.matmul %58, %59, %cst_34 {dimension_numbers = #tpu.dot_dimension_numbers<[1], [1], [0], [0], [0, 0, 1, 0], [], []>} : vector<8x8xbf16>, vector<12x8xbf16>, vector<8x12xf32> -> vector<8x12xf32>
    %61 = arith.addf %60, %32 : vector<8x12xf32>
    %cst_35 = arith.constant dense<0xFF800000> : vector<8xf32>
    %62 = vector.multi_reduction <maximumf>, %61, %cst_35 [1] : vector<8x12xf32> to vector<8xf32>
    %63 = vector.shape_cast %62 : vector<8xf32> to vector<8x1xf32>
    %64 = vector.broadcast %63 : vector<8x1xf32> to vector<8x12xf32>
    %65 = arith.subf %61, %64 : vector<8x12xf32>
    %66 = math.exp %65 : vector<8x12xf32>
    %cst_36 = arith.constant dense<0.000000e+00> : vector<8xf32>
    %67 = vector.multi_reduction <add>, %66, %cst_36 [1] : vector<8x12xf32> to vector<8xf32>
    %68 = vector.shape_cast %67 : vector<8xf32> to vector<8x1xf32>
    %69 = tpu.reciprocal %68 {approx = true} : vector<8x1xf32> -> vector<8x1xf32>
    %70 = vector.broadcast %69 : vector<8x1xf32> to vector<8x12xf32>
    %71 = arith.mulf %66, %70 : vector<8x12xf32>
    %c0_37 = arith.constant 0 : index
    %c1 = arith.constant 1 : index
    %c0_38 = arith.constant 0 : index
    %c0_39 = arith.constant 0 : index
    %72 = vector.load %arg13[%c0_37, %c1, %c0_38, %c0_39] : memref<1x4x8x12xf32, #tpu.memory_space<vmem>>, vector<1x1x8x12xf32>
    %73 = vector.shape_cast %72 : vector<1x1x8x12xf32> to vector<8x12xf32>
    %74 = vector.shape_cast %71 : vector<8x12xf32> to vector<1x1x8x12xf32>
    tpu.vector_store %arg13[%c0_37, %c1, %c0_38, %c0_39], %74 {strides = array<i32>} : memref<1x4x8x12xf32, #tpu.memory_space<vmem>>, vector<1x1x8x12xf32>,
    %75 = arith.truncf %71 : vector<8x12xf32> to vector<8x12xbf16>
    %76 = vector.extract_strided_slice %28 {offsets = [0, 8], sizes = [12, 8], strides = [1, 1]} : vector<12x32xbf16> to vector<12x8xbf16>
    %cst_40 = arith.constant dense<0.000000e+00> : vector<8x8xf32>
    %77 = tpu.matmul %75, %76, %cst_40 {dimension_numbers = #tpu.dot_dimension_numbers<[1], [0], [0], [1], [0, 0, 1, 1], [], []>} : vector<8x12xbf16>, vector<12x8xbf16>, vector<8x8xf32> -> vector<8x8xf32>
    %78 = arith.truncf %77 : vector<8x8xf32> to vector<8x8xbf16>
    %79 = vector.extract_strided_slice %30 {offsets = [8, 0], sizes = [8, 32], strides = [1, 1]} : vector<32x32xbf16> to vector<8x32xbf16>
    %cst_41 = arith.constant dense<0.000000e+00> : vector<8x32xf32>
    %80 = tpu.matmul %78, %79, %cst_41 {dimension_numbers = #tpu.dot_dimension_numbers<[1], [0], [0], [1], [0, 0, 1, 1], [], []>} : vector<8x8xbf16>, vector<8x32xbf16>, vector<8x32xf32> -> vector<8x32xf32>
    %81 = arith.addf %57, %80 : vector<8x32xf32>
    %82 = vector.extract_strided_slice %17 {offsets = [0, 16], sizes = [8, 8], strides = [1, 1]} : vector<8x32xbf16> to vector<8x8xbf16>
    %83 = vector.extract_strided_slice %26 {offsets = [0, 16], sizes = [12, 8], strides = [1, 1]} : vector<12x32xbf16> to vector<12x8xbf16>
    %cst_42 = arith.constant dense<0.000000e+00> : vector<8x12xf32>
    %84 = tpu.matmul %82, %83, %cst_42 {dimension_numbers = #tpu.dot_dimension_numbers<[1], [1], [0], [0], [0, 0, 1, 0], [], []>} : vector<8x8xbf16>, vector<12x8xbf16>, vector<8x12xf32> -> vector<8x12xf32>
    %85 = arith.addf %84, %32 : vector<8x12xf32>
    %cst_43 = arith.constant dense<0xFF800000> : vector<8xf32>
    %86 = vector.multi_reduction <maximumf>, %85, %cst_43 [1] : vector<8x12xf32> to vector<8xf32>
    %87 = vector.shape_cast %86 : vector<8xf32> to vector<8x1xf32>
    %88 = vector.broadcast %87 : vector<8x1xf32> to vector<8x12xf32>
    %89 = arith.subf %85, %88 : vector<8x12xf32>
    %90 = math.exp %89 : vector<8x12xf32>
    %cst_44 = arith.constant dense<0.000000e+00> : vector<8xf32>
    %91 = vector.multi_reduction <add>, %90, %cst_44 [1] : vector<8x12xf32> to vector<8xf32>
    %92 = vector.shape_cast %91 : vector<8xf32> to vector<8x1xf32>
    %93 = tpu.reciprocal %92 {approx = true} : vector<8x1xf32> -> vector<8x1xf32>
    %94 = vector.broadcast %93 : vector<8x1xf32> to vector<8x12xf32>
    %95 = arith.mulf %90, %94 : vector<8x12xf32>
    %c0_45 = arith.constant 0 : index
    %c2 = arith.constant 2 : index
    %c0_46 = arith.constant 0 : index
    %c0_47 = arith.constant 0 : index
    %96 = vector.load %arg13[%c0_45, %c2, %c0_46, %c0_47] : memref<1x4x8x12xf32, #tpu.memory_space<vmem>>, vector<1x1x8x12xf32>
    %97 = vector.shape_cast %96 : vector<1x1x8x12xf32> to vector<8x12xf32>
    %98 = vector.shape_cast %95 : vector<8x12xf32> to vector<1x1x8x12xf32>
    tpu.vector_store %arg13[%c0_45, %c2, %c0_46, %c0_47], %98 {strides = array<i32>} : memref<1x4x8x12xf32, #tpu.memory_space<vmem>>, vector<1x1x8x12xf32>,
    %99 = arith.truncf %95 : vector<8x12xf32> to vector<8x12xbf16>
    %100 = vector.extract_strided_slice %28 {offsets = [0, 16], sizes = [12, 8], strides = [1, 1]} : vector<12x32xbf16> to vector<12x8xbf16>
    %cst_48 = arith.constant dense<0.000000e+00> : vector<8x8xf32>
    %101 = tpu.matmul %99, %100, %cst_48 {dimension_numbers = #tpu.dot_dimension_numbers<[1], [0], [0], [1], [0, 0, 1, 1], [], []>} : vector<8x12xbf16>, vector<12x8xbf16>, vector<8x8xf32> -> vector<8x8xf32>
    %102 = arith.truncf %101 : vector<8x8xf32> to vector<8x8xbf16>
    %103 = vector.extract_strided_slice %30 {offsets = [16, 0], sizes = [8, 32], strides = [1, 1]} : vector<32x32xbf16> to vector<8x32xbf16>
    %cst_49 = arith.constant dense<0.000000e+00> : vector<8x32xf32>
    %104 = tpu.matmul %102, %103, %cst_49 {dimension_numbers = #tpu.dot_dimension_numbers<[1], [0], [0], [1], [0, 0, 1, 1], [], []>} : vector<8x8xbf16>, vector<8x32xbf16>, vector<8x32xf32> -> vector<8x32xf32>
    %105 = arith.addf %81, %104 : vector<8x32xf32>
    %106 = vector.extract_strided_slice %17 {offsets = [0, 24], sizes = [8, 8], strides = [1, 1]} : vector<8x32xbf16> to vector<8x8xbf16>
    %107 = vector.extract_strided_slice %26 {offsets = [0, 24], sizes = [12, 8], strides = [1, 1]} : vector<12x32xbf16> to vector<12x8xbf16>
    %cst_50 = arith.constant dense<0.000000e+00> : vector<8x12xf32>
    %108 = tpu.matmul %106, %107, %cst_50 {dimension_numbers = #tpu.dot_dimension_numbers<[1], [1], [0], [0], [0, 0, 1, 0], [], []>} : vector<8x8xbf16>, vector<12x8xbf16>, vector<8x12xf32> -> vector<8x12xf32>
    %109 = arith.addf %108, %32 : vector<8x12xf32>
    %cst_51 = arith.constant dense<0xFF800000> : vector<8xf32>
    %110 = vector.multi_reduction <maximumf>, %109, %cst_51 [1] : vector<8x12xf32> to vector<8xf32>
    %111 = vector.shape_cast %110 : vector<8xf32> to vector<8x1xf32>
    %112 = vector.broadcast %111 : vector<8x1xf32> to vector<8x12xf32>
    %113 = arith.subf %109, %112 : vector<8x12xf32>
    %114 = math.exp %113 : vector<8x12xf32>
    %cst_52 = arith.constant dense<0.000000e+00> : vector<8xf32>
    %115 = vector.multi_reduction <add>, %114, %cst_52 [1] : vector<8x12xf32> to vector<8xf32>
    %116 = vector.shape_cast %115 : vector<8xf32> to vector<8x1xf32>
    %117 = tpu.reciprocal %116 {approx = true} : vector<8x1xf32> -> vector<8x1xf32>
    %118 = vector.broadcast %117 : vector<8x1xf32> to vector<8x12xf32>
    %119 = arith.mulf %114, %118 : vector<8x12xf32>
    %c0_53 = arith.constant 0 : index
    %c3 = arith.constant 3 : index
    %c0_54 = arith.constant 0 : index
    %c0_55 = arith.constant 0 : index
    %120 = vector.load %arg13[%c0_53, %c3, %c0_54, %c0_55] : memref<1x4x8x12xf32, #tpu.memory_space<vmem>>, vector<1x1x8x12xf32>
    %121 = vector.shape_cast %120 : vector<1x1x8x12xf32> to vector<8x12xf32>
    %122 = vector.shape_cast %119 : vector<8x12xf32> to vector<1x1x8x12xf32>
    tpu.vector_store %arg13[%c0_53, %c3, %c0_54, %c0_55], %122 {strides = array<i32>} : memref<1x4x8x12xf32, #tpu.memory_space<vmem>>, vector<1x1x8x12xf32>,
    %123 = arith.truncf %119 : vector<8x12xf32> to vector<8x12xbf16>
    %124 = vector.extract_strided_slice %28 {offsets = [0, 24], sizes = [12, 8], strides = [1, 1]} : vector<12x32xbf16> to vector<12x8xbf16>
    %cst_56 = arith.constant dense<0.000000e+00> : vector<8x8xf32>
    %125 = tpu.matmul %123, %124, %cst_56 {dimension_numbers = #tpu.dot_dimension_numbers<[1], [0], [0], [1], [0, 0, 1, 1], [], []>} : vector<8x12xbf16>, vector<12x8xbf16>, vector<8x8xf32> -> vector<8x8xf32>
    %126 = arith.truncf %125 : vector<8x8xf32> to vector<8x8xbf16>
    %127 = vector.extract_strided_slice %30 {offsets = [24, 0], sizes = [8, 32], strides = [1, 1]} : vector<32x32xbf16> to vector<8x32xbf16>
    %cst_57 = arith.constant dense<0.000000e+00> : vector<8x32xf32>
    %128 = tpu.matmul %126, %127, %cst_57 {dimension_numbers = #tpu.dot_dimension_numbers<[1], [0], [0], [1], [0, 0, 1, 1], [], []>} : vector<8x8xbf16>, vector<8x32xbf16>, vector<8x32xf32> -> vector<8x32xf32>
    %129 = arith.addf %105, %128 : vector<8x32xf32>
    %c0_58 = arith.constant 0 : index
    %c0_59 = arith.constant 0 : index
    %130 = vector.load %arg9[%c0_58, %c0_59] : memref<1x32xf32, #tpu.memory_space<vmem>>, vector<1x32xf32>
    %131 = vector.broadcast %130 : vector<1x32xf32> to vector<8x32xf32>
    %132 = arith.addf %129, %131 : vector<8x32xf32>
    %133 = arith.addf %1, %132 : vector<8x32xf32>
    %cst_60 = arith.constant dense<0.000000e+00> : vector<8xf32>
    %134 = vector.multi_reduction <add>, %133, %cst_60 [1] : vector<8x32xf32> to vector<8xf32>
    %135 = vector.shape_cast %134 : vector<8xf32> to vector<8x1xf32>
    %cst_61 = arith.constant 3.200000e+01 : f32
    %136 = vector.broadcast %cst_61 : f32 to vector<8x1xf32>
    %137 = arith.divf %135, %136 : vector<8x1xf32>
    %138 = vector.broadcast %137 : vector<8x1xf32> to vector<8x32xf32>
    %139 = arith.subf %133, %138 : vector<8x32xf32>
    %140 = arith.mulf %139, %139 : vector<8x32xf32>
    %cst_62 = arith.constant dense<0.000000e+00> : vector<8xf32>
    %141 = vector.multi_reduction <add>, %140, %cst_62 [1] : vector<8x32xf32> to vector<8xf32>
    %142 = vector.shape_cast %141 : vector<8xf32> to vector<8x1xf32>
    %cst_63 = arith.constant 3.200000e+01 : f32
    %143 = vector.broadcast %cst_63 : f32 to vector<8x1xf32>
    %144 = arith.divf %142, %143 : vector<8x1xf32>
    %145 = vector.broadcast %137 : vector<8x1xf32> to vector<8x32xf32>
    %146 = arith.subf %133, %145 : vector<8x32xf32>
    %cst_64 = arith.constant 9.99999974E-6 : f32
    %147 = vector.broadcast %cst_64 : f32 to vector<8x1xf32>
    %148 = arith.addf %144, %147 : vector<8x1xf32>
    %149 = math.rsqrt %148 : vector<8x1xf32>
    %150 = vector.broadcast %149 : vector<8x1xf32> to vector<8x32xf32>
    %151 = arith.mulf %146, %150 : vector<8x32xf32>
    %152 = vector.broadcast %6 : vector<1x32xf32> to vector<8x32xf32>
    %153 = arith.mulf %151, %152 : vector<8x32xf32>
    %154 = vector.broadcast %7 : vector<1x32xf32> to vector<8x32xf32>
    %155 = arith.addf %153, %154 : vector<8x32xf32>
    %c0_65 = arith.constant 0 : index
    %c0_66 = arith.constant 0 : index
    %c0_67 = arith.constant 0 : index
    %156 = vector.load %arg12[%c0_65, %c0_66, %c0_67] : memref<1x8x32xf32, #tpu.memory_space<vmem>>, vector<1x8x32xf32>
    %157 = vector.shape_cast %156 : vector<1x8x32xf32> to vector<8x32xf32>
    %158 = vector.shape_cast %155 : vector<8x32xf32> to vector<1x8x32xf32>
    tpu.vector_store %arg12[%c0_65, %c0_66, %c0_67], %158 {strides = array<i32>} : memref<1x8x32xf32, #tpu.memory_space<vmem>>, vector<1x8x32xf32>,
    return
  }
  func.func @transform_0(%arg0: i32) -> (i32, i32, i32) {
    %c0_i32 = arith.constant 0 : i32
    %c0_i32_0 = arith.constant 0 : i32
    %c0_i32_1 = arith.constant 0 : i32
    return %arg0, %c0_i32, %c0_i32_0 : i32, i32, i32
  }
  func.func @transform_1(%arg0: i32) -> (i32, i32, i32) {
    %c0_i32 = arith.constant 0 : i32
    %c0_i32_0 = arith.constant 0 : i32
    %c0_i32_1 = arith.constant 0 : i32
    return %arg0, %c0_i32, %c0_i32_0 : i32, i32, i32
  }
  func.func @transform_2(%arg0: i32) -> (i32, i32, i32) {
    %c0_i32 = arith.constant 0 : i32
    %c0_i32_0 = arith.constant 0 : i32
    %c0_i32_1 = arith.constant 0 : i32
    return %arg0, %c0_i32, %c0_i32_0 : i32, i32, i32
  }
  func.func @transform_3(%arg0: i32) -> (i32, i32) {
    %c0_i32 = arith.constant 0 : i32
    %c0_i32_0 = arith.constant 0 : i32
    %c0_i32_1 = arith.constant 0 : i32
    return %c0_i32, %c0_i32_0 : i32, i32
  }
  func.func @transform_4(%arg0: i32) -> (i32, i32) {
    %c0_i32 = arith.constant 0 : i32
    %c0_i32_0 = arith.constant 0 : i32
    %c0_i32_1 = arith.constant 0 : i32
    return %c0_i32, %c0_i32_0 : i32, i32
  }
  func.func @transform_5(%arg0: i32) -> (i32, i32) {
    %c0_i32 = arith.constant 0 : i32
    %c0_i32_0 = arith.constant 0 : i32
    %c0_i32_1 = arith.constant 0 : i32
    return %c0_i32, %c0_i32_0 : i32, i32
  }
  func.func @transform_6(%arg0: i32) -> (i32, i32) {
    %c0_i32 = arith.constant 0 : i32
    %c0_i32_0 = arith.constant 0 : i32
    %c0_i32_1 = arith.constant 0 : i32
    return %c0_i32, %c0_i32_0 : i32, i32
  }
  func.func @transform_7(%arg0: i32) -> (i32, i32) {
    %c0_i32 = arith.constant 0 : i32
    %c0_i32_0 = arith.constant 0 : i32
    %c0_i32_1 = arith.constant 0 : i32
    return %c0_i32, %c0_i32_0 : i32, i32
  }
  func.func @transform_8(%arg0: i32) -> (i32, i32) {
    %c0_i32 = arith.constant 0 : i32
    %c0_i32_0 = arith.constant 0 : i32
    %c0_i32_1 = arith.constant 0 : i32
    return %c0_i32, %c0_i32_0 : i32, i32
  }
  func.func @transform_9(%arg0: i32) -> (i32, i32) {
    %c0_i32 = arith.constant 0 : i32
    %c0_i32_0 = arith.constant 0 : i32
    %c0_i32_1 = arith.constant 0 : i32
    return %c0_i32, %c0_i32_0 : i32, i32
  }
  func.func @transform_10(%arg0: i32) -> (i32, i32) {
    %c0_i32 = arith.constant 0 : i32
    %c0_i32_0 = arith.constant 0 : i32
    %c0_i32_1 = arith.constant 0 : i32
    return %c0_i32, %c0_i32_0 : i32, i32
  }
  func.func @transform_11(%arg0: i32) -> (i32, i32, i32) {
    %c0_i32 = arith.constant 0 : i32
    %c0_i32_0 = arith.constant 0 : i32
    %c0_i32_1 = arith.constant 0 : i32
    return %arg0, %c0_i32, %c0_i32_0 : i32, i32, i32
  }
  func.func @transform_12(%arg0: i32) -> (i32, i32, i32, i32) {
    %c0_i32 = arith.constant 0 : i32
    %c0_i32_0 = arith.constant 0 : i32
    %c0_i32_1 = arith.constant 0 : i32
    %c0_i32_2 = arith.constant 0 : i32
    return %arg0, %c0_i32, %c0_i32_0, %c0_i32_1 : i32, i32, i32, i32
  }
}

</mosaic_0001>

<bundles_post_ra>
// kernel: tpu_custom_call.1
= control target key start
LH: loop header
LB: loop body
LE: loop exit
PB: predicated region body
PF: predicated region fallthrough
CT: control target
= control target key end

     0   :  { %s1724_s0 = inlined_call_operand.vmem [shape: f32[2,8,32], index: 0, kind: input, shape index: {}]   ;;  %s1725_s1 = inlined_call_operand.vmem [shape: f32[2,12,32], index: 1, kind: input, shape index: {}]   ;;  %s1726_s2 = inlined_call_operand.vmem [shape: f32[2,1,12], index: 2, kind: input, shape index: {}]   ;;  %s1727_s3 = inlined_call_operand.vmem [shape: f32[32,32], index: 3, kind: input, shape index: {}]   ;;  %s1728_s4 = inlined_call_operand.vmem [shape: f32[1,32], index: 4, kind: input, shape index: {}]   ;;  %s1729_s5 = inlined_call_operand.hbm [shape: f32[32,64], index: 5, kind: input, shape index: {}]   ;;  %s1730_s6 = inlined_call_operand.vmem [shape: f32[1,64], index: 6, kind: input, shape index: {}]   ;;  %s1731_s7 = inlined_call_operand.hbm [shape: f32[32,32], index: 7, kind: input, shape index: {}]   ;;  %s1732_s8 = inlined_call_operand.vmem [shape: f32[1,32], index: 8, kind: input, shape index: {}]   ;;  %s1733_s9 = inlined_call_operand.vmem [shape: f32[1,32], index: 9, kind: input, shape index: {}]   ;;  %s1734_s10 = inlined_call_operand.vmem [shape: f32[1,32], index: 10, kind: input, shape index: {}]   ;;  %s1735_s11 = inlined_call_operand.hbm [shape: f32[2,8,32], index: 11, kind: output, shape index: {0}]   ;;  %s1736_s12 = inlined_call_operand.hbm [shape: f32[2,4,8,12], index: 12, kind: output, shape index: {1}]  }
   0x1   :  { %1741 = sst [smem:[#allocation18_spill]] %s1729_s5 }
   0x2   :  { %1742 = sst [smem:[#allocation19_spill]] %s1731_s7 }
   0x3   :  { %18 = vsyncpa [#allocation3], 0 }
   0x4   :  { %19 = vsyncpa [#allocation6], 0 }
   0x5   :  { %20 = vsyncpa [#allocation4], 0 }
   0x6   :  { %22 = vsyncpa [#allocation4 + $0x1], 0 }
   0x7   :  { %23 = vsyncpa [#allocation9], 0 }
   0x8   :  { %25 = vsyncpa [#allocation9 + $0x1], 0  ;;  %s1488_s21 = smov 0   ;;  %s1490_s22 = smov 0  }
   0x9   :  { %s1492_s23 = smov 0   ;;  %s1494_s24 = smov 0  }
   0xa LB: > { %1743 = sst [smem:[#allocation14_spill]] %s1403_s23  ;;  %s1509_s25 = sadd.s32 4294967295, %s1407_s24   ;;  %s1407_s24 = sphi %s1494_s24, %s1753_s24   ;;  %s1403_s23 = sphi %s1492_s23, %s1755_s23   ;;  %s1399_s22 = sphi %s1490_s22, %s1757_s22   ;;  %s1395_s21 = sphi %s1488_s21, %s1756_s21  }
   0xb   : > { %s1104_s26 = sadd.s32 4294967294, %s1407_s24   ;;  %s1513_s27 = sadd.s32 1, %s1407_s24  }
   0xc   : > { %1744 = sst [smem:[#allocation15_spill]] %s1513_s27  ;;  %s284_s28 = sadd.s32 1, %s1403_s23 }
   0xd   : > { %s281_s29 = ssub.s32 %s1407_s24, %s1513_s27  ;;  %p294_p0 = scmp.ne.s32.totalorder %s1403_s23, %s1399_s22 }
   0xe   : > { %p282_p1 = scmp.eq.s32.totalorder %s281_s29, 0  ;;  %p295_p2 = scmp.eq.s32.totalorder %s1509_s25, 1 }
   0xf   : > { %p300_p3 = scmp.ne.s32.totalorder %s1399_s22, %s1395_s21  ;;  %p301_p4 = scmp.eq.s32.totalorder %s1104_s26, 1 }
  0x10   : > { %s1524_s30 = scalar_select %p282_p1, %s1403_s23, %s284_s28  }
  0x11   : > { %p1526_p5 = por %p295_p2, %p294_p0  ;;  %p1530_p6 = por %p301_p4, %p300_p3 }
  0x12   : > { %1745 = sst [smem:[#allocation16_spill]] %s1524_s30  ;;  %p1105_p7 = scmp.ge.s32.totalorder %s1407_s24, 1 }
  0x13   : > { %s1747_s14 = scalar_select %p1530_p6, 1, 0 }
  0x14   : > { %p334_p8 = scmp.lt.s32.totalorder %s1407_s24, 3  ;;  %p1169_p9 = scmp.eq.s32.totalorder %s1509_s25, 0 }
  0x15   : > { %1748 = sst [smem:[#allocation17_spill]] %s1747_s14  ;;  %s1409_s19 = smov [#allocation2]  }
  0x16   : > { %p1537_p10 = pnand %p1105_p7, %p334_p8  ;;  %s1750_s5 = sld [smem:[#allocation18_spill]] }
  0x17   : > { %s353_s20 = sshll.u32 %s1409_s19, 4  ;;  %s1751_s7 = sld [smem:[#allocation19_spill]]  ;;  %s354_s20 = int_to_ptr.vmem [resolvable:$true] %s353_s20 }
  0x18   : > { %p1155_p11 = pneg %p1537_p10  ;;  %s1410_s30 = smov 128  }
  0x19   : > { %s1411_s23 = smov 8   ;;  %s1412_s27 = smov [#allocation5]  }
  0x1a   : > { %p1156_p12 = pnand %p1169_p9, %p1155_p11  ;;  %s370_s16 = sshll.u32 %s1412_s27, 4  ;;  %s371_s16 = int_to_ptr.vmem [resolvable:$true] %s370_s16 }
  0x1b   : > { %416 = sbr.rel (%p1537_p10) target bundleno = 1664 (0x680), region = 64 }
  0x1c   : > { %s351_s18 = sshll.u32 %s1750_s5, 4  ;;  %s352_s18 = int_to_ptr.hbm [resolvable:$true] %s351_s18 }
  0x1d   : > { %s368_s29 = sshll.u32 %s1751_s7, 4  ;;  %s369_s29 = int_to_ptr.hbm [resolvable:$true] %s368_s29 }
  0x1e   : > { %1158 = dma.hbm_to_vmem [thread:$0]  (!%p1156_p12), %s352_s18, 512, %s354_s20, [#allocation3], %s1410_s30, %s1410_s30, %s1411_s23  }
  0x1f   : > { %1161 = dma.hbm_to_vmem [thread:$0]  (!%p1156_p12), %s369_s29, 512, %s371_s16, [#allocation6], %s1410_s30, %s1410_s30, %s1411_s23  }
  0x20   : > { %1378 = dma.done.wait (%p1169_p9), [#allocation3], 512  }
  0x21   : > { %1380 = vsyncadd (%p1169_p9), [#allocation3], 4294966784 }
  0x22   : > { %1382 = dma.done.wait (%p1169_p9), [#allocation6], 512  }
  0x23   : > { %1384 = vsyncadd (%p1169_p9), [#allocation6], 4294966784  ;;  %p476_p13 = scmp.lt.s32.totalorder %s1509_s25, 1  ;;  %v498_v0 = vld [vmem:[%s1727_s3 + $0x10] sm:$0xff]  ;;  %v499_v1 = vld [vmem:[%s1727_s3 + $0x18] sm:$0xff]  ;;  %vm506_vm0 = vcmask 261120  }
  0x24   : > { %v528_v2 = vld [vmem:[#allocation2 + $0x10] sm:$0xff]  ;;  %v501_v3 = vpack.c.bf16 %v499_v1, %v498_v0  ;;  %v529_v4 = vld [vmem:[#allocation2 + $0x18] sm:$0xff]  ;;  %v496_v5 = vld [vmem:[%s1727_s3] sm:$0xff]  ;;  %vm571_vm1 = vcmask 64512   ;;  %s1414_s18 = smov 96   ;;  %s1415_s19 = smov 104  }
  0x25   : > { %s1563_s27 = scalar_select %p476_p13, %s1509_s25, 1  ;;  %v497_v6 = vld [vmem:[%s1727_s3 + $0x8] sm:$0xff]  ;;  %v531_v7 = vpack.c.bf16 %v529_v4, %v528_v2  ;;  %v526_v8 = vld [vmem:[#allocation2] sm:$0xff]  ;;  %vm693_vm2 = vcmask 1043456   ;;  %vm610_vm3 = vcmask 1045504   ;;  %vm591_vm4 = vcmask 97280  }
  0x26   : > { %v527_v9 = vld [vmem:[#allocation2 + $0x8] sm:$0xff]  ;;  %516 = vmatpush.bf16.msra.mxu0 %v501_v3  ;;  %v500_v10 = vpack.c.bf16 %v497_v6, %v496_v5  ;;  %v1220_v17 = vld [vmem:[%s1728_s4] ss:$0 sm:$0xff]  ;;  %s1416_s29 = smov 112   ;;  %s1417_s17 = smov 88  }
  0x27   : > { %s1114_s23 = sshll.u32 %s1563_s27, 3  ;;  %s1141_s30 = sshll.u32 %s1563_s27, 4  ;;  %545 = vmatpush.bf16.msra.mxu1 %v531_v7  ;;  %v530_v13 = vpack.c.bf16 %v527_v9, %v526_v8  ;;  %v1221_v21 = vld [vmem:[%s1730_s6] ss:$0 sm:$0xff] }
  0x28   : > { %s479_s28 = scalar_lea.vmem %s1724_s0, %s1114_s23  ;;  %s484_s5 = scalar_lea.vmem %s1725_s1, %s1141_s30  ;;  %v555_v36 = vld [vmem:[#allocation5] sm:$0xff] }
  0x29   : > { %v1585_v11 = vld [vmem:[%s479_s28] sm:$0xff]  ;;  %v491_v14 = vld [vmem:[%s484_s5 + $0x8] sm:$0xf]  ;;  %s1413_s30 = smov 120   ;;  %s487_s28 = scalar_lea.vmem %s1726_s2, %s1563_s27  ;;  %v559_v37 = vpack.c.bf16 %v555_v36, %v555_v36 }
  0x2a   : > { %v490_v12 = vld [vmem:[%s484_s5] sm:$0xff]  ;;  %v495_v15 = vpack.c.bf16 %v1585_v11, %v1585_v11  ;;  %517 = vmatpush.bf16.msra.mxu0 %v500_v10  ;;  %s1619_s27 = sand.u32 1, %s1399_s22   ;;  %s1418_s7 = smov 80  }
  0x2b   : > { %v525_v16 = vpack.c.bf16 %v491_v14, %v490_v12  ;;  %546 = vmatpush.bf16.msra.mxu1 %v530_v13  ;;  %v714_v38 = vsel %vm693_vm2, %v559_v37, 0  ;;  %v1222_v46 = vld [vmem:[%s487_s28] ss:$0 sm:$0xff]  ;;  %s1113_s16 = sshll.u32 %s1619_s27, 5  ;;  %s1419_s14 = smov 72  }
  0x2c   : > { %s1622_s15 = scalar_lea.vmem [#allocation8], %s1113_s16  ;;  %s1325_s23 = scalar_lea.hbm %s1736_s12, 64 }
  0x2d   : > { %1117 = vmatmul.msk.bf16.vlgmr.msra.gmra.mxu0 %vm506_vm0, %v495_v15 }
  0x2e   : > { %1118 = vmatmul.msk.bf16.vlgmr.msra.gmra.mxu1 %vm506_vm0, %v525_v16 }
  0xaa   : > { %v519_v18 = vpop.f32.mrf.mxu0 }
  0xab   : > { %v520_v19 = vadd.f32 %v1220_v17, %v519_v18  ;;  %v548_v20 = vpop.f32.mrf.mxu1 }
  0xac   : > { %v549_v24 = vadd.f32 %v1221_v21, %v548_v20 }
  0xad   : > { %v523_v22 = vmul.f32 0.35355338, %v520_v19 }
  0xae   : > { %v553_v29 = vpack.c.bf16 %v549_v24, %v549_v24 }
  0xaf   : > { %v524_v23 = vpack.c.bf16 %v523_v22, %v523_v22 }
  0xb0   : > { %v568_v32 = vunpack.c.l.b16 %v553_v29 }
  0xb1   : > { %v629_v25 = vunpack.c.l.b16 %v524_v23 }
  0xb2   : > { %v521_v26 = vpop.f32.mrf.mxu0 }
  0xb3   : > { %v550_v27 = vpop.f32.mrf.mxu1  ;;  %v630_v28 = vpack.c.b16 %v629_v25, %v629_v25 }
  0xb4   : > { %v551_v30 = vadd.f32 %v1221_v21, %v550_v27 }
  0xb5   : > { %631 = vrot.lane.b32.xlu2 %v630_v28, %s1413_s30 }
  0xb6   : > { %v554_v31 = vpack.c.bf16 %v551_v30, %v551_v30 }
  0xb8   : > { %v569_v33 = vunpack.c.l.b16 %v554_v31 }
  0xba   : > { %v1597_v34 = vpack.c.b16 %v569_v33, %v568_v32 }
  0xbc   : > { %605 = vrot.lane.b32.xlu1 %v1597_v34, %s1414_s18  ;;  %v576_v35 = vsel %vm571_vm1, %v1597_v34, 0  ;;  %s963_s18 = sshll.u32 %s1622_s15, 4  ;;  %s964_s18 = int_to_ptr.vmem [resolvable:$true] %s963_s18 }
  0xbd   : > { %585 = vmatpush.bf16.xpose.msra.mxu2 %v576_v35  ;;  %810 = vrot.lane.b32.xlu2 %v1597_v34, %s1415_s19 }
  0xc4   : > { %633 = vrot.lane.b32.xlu1 %v1597_v34, %s1413_s30  ;;  %1119 = vmatmul.msk.bf16.vlgmr.msra.gmra.mxu2 %vm571_vm1, %v524_v23  ;;  %s1142_s30 = sshll.u32 %s1509_s25, 5 }
  0xc5   : > { %729 = vrot.lane.b32.xlu2 %v630_v28, %s1416_s29  ;;  %723 = vmatpush.bf16.msrb.mxu2 %v714_v38  ;;  %s962_s26 = scalar_lea.hbm %s1736_s12, %s1142_s30 }
  0xc6   : > { %s965_s28 = sshll.u32 %s962_s26, 4  ;;  %s966_s28 = int_to_ptr.hbm [resolvable:$true] %s965_s28 }
  0xc7   : > { %s1319_s16 = sshra.s32 %s966_s28, 4  ;;  %s1320_s16 = int_to_ptr.hbm [resolvable:$true] %s1319_s16 }
  0xc8   : > { %p1326_p3 = scmp.lt.s32.totalorder %s1320_s16, %s1736_s12 }
  0xcc   : > { %808 = vrot.lane.b32.xlu1 %v630_v28, %s1415_s19 }
 0x10f   : > { %v632_v39 = vpop.permute.xlu2 %631 }
 0x117   : > { %v811_v40 = vpop.permute.xlu2 %810 }
 0x118   : > { %v816_v41 = vsel %vm571_vm1, %v811_v40, 0 }
 0x119   : > { %825 = vmatpush.bf16.xpose.msra.mxu2 %v816_v41 }
 0x11f   : > { %v730_v62 = vpop.permute.xlu2 %729 }
 0x12e   : > { %v606_v42 = vpop.permute.xlu1 %605 }
 0x12f   : > { %v612_v43 = vsel %vm610_vm3, %v606_v42, 0 }
 0x130   : > { %621 = vmatpush.bf16.msra.mxu3 %v612_v43 }
 0x136   : > { %v634_v44 = vpop.permute.xlu1 %633 }
 0x137   : > { %v639_v45 = vsel %vm571_vm1, %v634_v44, 0 }
 0x138   : > { %648 = vmatpush.bf16.xpose.msrb.mxu3 %v639_v45 }
 0x13e   : > { %v809_v4 = vpop.permute.xlu1 %808 }
 0x147   : > { %v587_v47 = vpop.f32.mrf.mxu2 }
 0x148   : > { %v588_v48 = vadd.f32 %v1222_v46, %v587_v47 }
 0x14a   : > { %v592_v49 = vsel %vm591_vm4, %v588_v48, -inf }
 0x14b   : > { %593 = vmax.xlane.f32.xlu0 %v592_v49  ;;  %v557_v49 = vld [vmem:[#allocation5 + $0x10] sm:$0xff] }
 0x14f   : > { %v589_v50 = vpop.f32.mrf.mxu2 }
 0x150   : > { %v561_v50 = vpack.c.bf16 %v557_v49, %v557_v49 }
 0x1be   : > { %v594_v51 = vpop.xlane.xlu0 %593 }
 0x1bf   : > { %v595_v52 = vsub.f32 %v588_v48, %v594_v51 }
 0x1c1   : > { %v596_v53 = vmul.f32 1.442695, %v595_v52  ;;  %v792_v52 = vsel %vm693_vm2, %v561_v50, 0 }
 0x1c3   : > { %1225 = vpow2.f32 %v596_v53 }
 0x1c9   : > { %v1226_v54 = vpop.eup %1225 }
 0x1ca   : > { %v598_v55 = vsel %vm591_vm4, %v1226_v54, 0.0 }
 0x1cb   : > { %599 = vadd.xlane.f32.xlu0 %v598_v55 }
 0x1df   : > { %731 = vrot.lane.b32.xlu0 %v1597_v34, %s1416_s29  ;;  %s937_s29 = scalar_lea.sflag [#allocation9], %s1619_s27 }
 0x23e   : > { %v600_v56 = vpop.xlane.xlu0 %599 }
 0x23f   : > { %1227 = vrcp.f32 %v600_v56 }
 0x245   : > { %v1228_v57 = vpop.eup %1227 }
 0x246   : > { %v602_v58 = vmul.f32 %v1228_v57, %v1226_v54 }
 0x248   : > { %v604_v59 = vpack.c.bf16 %v602_v58, %v602_v58  ;;  %603 = vst.msk [vmem:[%s1622_s15] sm:$0xff] %vm591_vm4, %v602_v58 }
 0x24a   : > { %1120 = vmatmul.msk.bf16.vlgmr.msra.gmra.mxu3 %vm591_vm4, %v604_v59 }
 0x251   : > { %v732_v60 = vpop.permute.xlu0 %731 }
 0x252   : > { %v737_v61 = vsel %vm571_vm1, %v732_v60, 0 }
 0x253   : > { %746 = vmatpush.bf16.xpose.msra.mxu3 %v737_v61 }
 0x25a   : > { %1121 = vmatmul.msk.bf16.vlgmr.msrb.gmra.mxu3 %vm571_vm1, %v632_v39 }
 0x26a   : > { %1126 = vmatmul.msk.bf16.vlgmr.msra.gmra.mxu3 %vm571_vm1, %v730_v62 }
 0x2cd   : > { %v623_v63 = vpop.f32.mrf.mxu3 }
 0x2ce   : > { %v627_v0 = vpack.c.bf16 %v623_v63, %v623_v63  ;;  %v558_v63 = vld [vmem:[#allocation5 + $0x18] sm:$0xff] }
 0x2d0   : > { %1125 = vmatmul.msk.bf16.vlgmr.msrb.gmra.mxu2 %vm571_vm1, %v627_v0  ;;  %v562_v0 = vpack.c.bf16 %v558_v63, %v558_v63 }
 0x2d5   : > { %v625_v1 = vpop.f32.mrf.mxu3 }
 0x2d6   : > { %v871_v1 = vsel %vm693_vm2, %v562_v0, 0 }
 0x2dd   : > { %v650_v2 = vpop.f32.mrf.mxu3 }
 0x2de   : > { %v651_v3 = vadd.f32 %v1222_v46, %v650_v2 }
 0x2e0   : > { %1130 = vmatmul.msk.bf16.vlgmr.msra.gmra.mxu2 %vm571_vm1, %v809_v4  ;;  %v654_v5 = vsel %vm591_vm4, %v651_v3, -inf }
 0x2e1   : > { %655 = vmax.xlane.f32.xlu1 %v654_v5 }
 0x2e5   : > { %v652_v6 = vpop.f32.mrf.mxu3 }
 0x2ed   : > { %v748_v7 = vpop.f32.mrf.mxu3 }
 0x2ee   : > { %v749_v8 = vadd.f32 %v1222_v46, %v748_v7 }
 0x2f0   : > { %v752_v9 = vsel %vm591_vm4, %v749_v8, -inf }
 0x2f1   : > { %753 = vmax.xlane.f32.xlu0 %v752_v9 }
 0x2f5   : > { %v750_v10 = vpop.f32.mrf.mxu3 }
 0x2fa   : > { %668 = vrot.lane.b32.xlu1 %v1597_v34, %s1417_s17  ;;  %s1321_s17 = scalar_lea.hbm %s1320_s16, 32 }
 0x2fb   : > { %p1322_p0 = scmp.ne.s32.totalorder %s1320_s16, %s1321_s17  ;;  %p1327_p4 = scmp.lt.s32.totalorder %s1325_s23, %s1321_s17 }
 0x2fd   : > { %p1323_p1 = pnand %p1322_p0, %p1526_p5  ;;  %p1328_p7 = por %p1327_p4, %p1326_p3 }
 0x2ff   : > { %p1324_p2 = pneg %p1323_p1 }
 0x301   : > { %p1329_p8 = pnand %p1328_p7, %p1324_p2 }
 0x353   : > { %v1635_v12 = vpop.f32.mrf.mxu2 }
 0x354   : > { %v656_v13 = vpop.xlane.xlu1 %655 }
 0x355   : > { %v657_v15 = vsub.f32 %v651_v3, %v656_v13  ;;  %v1223_v13 = vld [vmem:[%s1732_s8] ss:$0 sm:$0xff] }
 0x357   : > { %v658_v16 = vmul.f32 1.442695, %v657_v15 }
 0x359   : > { %1229 = vpow2.f32 %v658_v16 }
 0x35b   : > { %v727_v14 = vpop.f32.mrf.mxu2 }
 0x35f   : > { %v1230_v23 = vpop.eup %1229 }
 0x360   : > { %v660_v27 = vsel %vm591_vm4, %v1230_v23, 0.0 }
 0x363   : > { %v827_v17 = vpop.f32.mrf.mxu2 }
 0x364   : > { %v828_v18 = vadd.f32 %v1222_v46, %v827_v17  ;;  %v754_v19 = vpop.xlane.xlu0 %753  ;;  %v556_v46 = vld [vmem:[#allocation5 + $0x8] sm:$0xff] }
 0x365   : > { %v755_v20 = vsub.f32 %v749_v8, %v754_v19  ;;  %v560_v47 = vpack.c.bf16 %v556_v46, %v556_v46 }
 0x366   : > { %v831_v21 = vsel %vm591_vm4, %v828_v18, -inf }
 0x367   : > { %v756_v22 = vmul.f32 1.442695, %v755_v20  ;;  %832 = vmax.xlane.f32.xlu2 %v831_v21  ;;  %v695_v48 = vsel %vm693_vm2, %v560_v47, 0  ;;  %v1420_v20 = vmov 32.0  }
 0x368   : > { %704 = vmatpush.bf16.msrb.mxu1 %v695_v48 }
 0x369   : > { %1231 = vpow2.f32 %v756_v22 }
 0x36b   : > { %v829_v24 = vpop.f32.mrf.mxu2 }
 0x36c   : > { %v669_v25 = vpop.permute.xlu1 %668  ;;  %801 = vmatpush.bf16.msra.mxu1 %v792_v52 }
 0x36d   : > { %v674_v26 = vsel %vm610_vm3, %v669_v25, 0 }
 0x36e   : > { %683 = vmatpush.bf16.msrb.mxu0 %v674_v26 }
 0x36f   : > { %v1232_v28 = vpop.eup %1231  ;;  %661 = vadd.xlane.f32.xlu2 %v660_v27 }
 0x370   : > { %v758_v29 = vsel %vm591_vm4, %v1232_v28, 0.0 }
 0x371   : > { %759 = vadd.xlane.f32.xlu0 %v758_v29 }
 0x385   : > { %766 = vrot.lane.b32.xlu0 %v1597_v34, %s1418_s7 }
 0x3da   : > { %v833_v30 = vpop.xlane.xlu2 %832 }
 0x3db   : > { %v834_v31 = vsub.f32 %v828_v18, %v833_v30 }
 0x3dd   : > { %v835_v32 = vmul.f32 1.442695, %v834_v31 }
 0x3df   : > { %1233 = vpow2.f32 %v835_v32 }
 0x3e2   : > { %v662_v33 = vpop.xlane.xlu2 %661 }
 0x3e3   : > { %1235 = vrcp.f32 %v662_v33 }
 0x3e4   : > { %v760_v35 = vpop.xlane.xlu0 %759 }
 0x3e5   : > { %v1234_v36 = vpop.eup %1233  ;;  %1237 = vrcp.f32 %v760_v35 }
 0x3e6   : > { %v837_v37 = vsel %vm591_vm4, %v1234_v36, 0.0 }
 0x3e7   : > { %838 = vadd.xlane.f32.xlu2 %v837_v37 }
 0x3e9   : > { %v1236_v38 = vpop.eup %1235 }
 0x3ea   : > { %v664_v39 = vmul.f32 %v1236_v38, %v1230_v23 }
 0x3eb   : > { %v1238_v40 = vpop.eup %1237 }
 0x3ec   : > { %v762_v41 = vmul.f32 %v1238_v40, %v1232_v28  ;;  %v667_v42 = vpack.c.bf16 %v664_v39, %v664_v39  ;;  %1122 = vst.msk [vmem:[%s1622_s15 + $0x8] sm:$0xff] %vm591_vm4, %v664_v39 }
 0x3ee   : > { %1123 = vmatmul.msk.bf16.vlgmr.msrb.gmra.mxu0 %vm591_vm4, %v667_v42  ;;  %1127 = vst.msk [vmem:[%s1622_s15 + $0x10] sm:$0xff] %vm591_vm4, %v762_v41  ;;  %v765_v45 = vpack.c.bf16 %v762_v41, %v762_v41 }
 0x3f7   : > { %v767_v43 = vpop.permute.xlu0 %766 }
 0x3f8   : > { %v772_v44 = vsel %vm610_vm3, %v767_v43, 0 }
 0x3f9   : > { %781 = vmatpush.bf16.msra.mxu0 %v772_v44 }
 0x3fd   : > { %880 = vmatpush.bf16.msrb.mxu0 %v871_v1 }
 0x3fe   : > { %1128 = vmatmul.msk.bf16.vlgmr.msra.gmra.mxu0 %vm591_vm4, %v765_v45 }
 0x3ff   : > { %845 = vrot.lane.b32.xlu2 %v1597_v34, %s1419_s14 }
 0x45a   : > { %v839_v51 = vpop.xlane.xlu2 %838 }
 0x45b   : > { %1239 = vrcp.f32 %v839_v51 }
 0x45c   : > { %1241 = vrcp.f32 %v1420_v20 }
 0x461   : > { %v1240_v53 = vpop.eup %1239 }
 0x462   : > { %v841_v54 = vmul.f32 %v1240_v53, %v1234_v36  ;;  %v846_v55 = vpop.permute.xlu2 %845 }
 0x463   : > { %v851_v56 = vsel %vm610_vm3, %v846_v55, 0 }
 0x464   : > { %v844_v57 = vpack.c.bf16 %v841_v54, %v841_v54  ;;  %860 = vmatpush.bf16.msrb.mxu3 %v851_v56  ;;  %1131 = vst.msk [vmem:[%s1622_s15 + $0x18] sm:$0xff] %vm591_vm4, %v841_v54 }
 0x467   : > { %1132 = vmatmul.msk.bf16.vlgmr.msrb.gmra.mxu3 %vm591_vm4, %v844_v57 }
 0x46b   : > { %v685_v34 = vpop.f32.mrf.mxu0 }
 0x46c   : > { %v689_v58 = vpack.c.bf16 %v685_v34, %v685_v34 }
 0x46e   : > { %1124 = vmatmul.msk.bf16.vlgmr.msrb.gmra.mxu1 %vm571_vm1, %v689_v58 }
 0x473   : > { %v687_v59 = vpop.f32.mrf.mxu0 }
 0x47b   : > { %v783_v60 = vpop.f32.mrf.mxu0 }
 0x47c   : > { %v787_v61 = vpack.c.bf16 %v783_v60, %v783_v60 }
 0x47e   : > { %1129 = vmatmul.msk.bf16.vlgmr.msra.gmra.mxu1 %vm571_vm1, %v787_v61 }
 0x483   : > { %v785_v62 = vpop.f32.mrf.mxu0 }
 0x4ea   : > { %v862_v2 = vpop.f32.mrf.mxu3 }
 0x4eb   : > { %v866_v3 = vpack.c.bf16 %v862_v2, %v862_v2  ;;  %v706_v4 = vpop.f32.mrf.mxu1 }
 0x4ec   : > { %v726_v7 = vadd.f32 %v1635_v12, %v706_v4  ;;  %v1242_v12 = vpop.eup %1241 }
 0x4ed   : > { %1133 = vmatmul.msk.bf16.vlgmr.msrb.gmra.mxu0 %vm571_vm1, %v866_v3  ;;  %v897_v21 = vmul.f32 32.0, %v1242_v12  ;;  %vm901_vm5 = vweird.f32 %v1242_v12 }
 0x4ef   : > { %v898_v22 = vsub.f32 1.0, %v897_v21 }
 0x4f1   : > { %v899_v23 = vmul.f32 %v1242_v12, %v898_v22 }
 0x4f2   : > { %v864_v5 = vpop.f32.mrf.mxu3 }
 0x4f3   : > { %v708_v6 = vpop.f32.mrf.mxu1  ;;  %v900_v24 = vadd.f32 %v1242_v12, %v899_v23 }
 0x4f5   : > { %v902_v25 = vsel %vm901_vm5, %v1242_v12, %v900_v24 }
 0x4fb   : > { %v803_v8 = vpop.f32.mrf.mxu1 }
 0x4fc   : > { %v807_v9 = vadd.f32 %v803_v8, %v726_v7 }
 0x503   : > { %v805_v10 = vpop.f32.mrf.mxu1 }
 0x56a   : > { %v882_v14 = vpop.f32.mrf.mxu0 }
 0x56b   : > { %v886_v15 = vadd.f32 %v882_v14, %v807_v9 }
 0x56d   : > { %v891_v16 = vadd.f32 %v1223_v13, %v886_v15 }
 0x56f   : > { %v892_v17 = vadd.f32 %v891_v16, %v1585_v11 }
 0x571   : > { %v893_v18 = vsel %vm506_vm0, %v892_v17, 0.0 }
 0x572   : > { %894 = vadd.xlane.f32.xlu1 %v893_v18  ;;  %v884_v19 = vpop.f32.mrf.mxu0 }
 0x5e5   : > { %v895_v26 = vpop.xlane.xlu1 %894 }
 0x5e6   : > { %v903_v27 = vmul.f32 %v902_v25, %v895_v26 }
 0x5e8   : > { %v904_v11 = vsub.f32 %v892_v17, %v903_v27 }
 0x5ea   : > { %v905_v28 = vmul.f32 %v904_v11, %v904_v11 }
 0x5ec   : > { %v906_v29 = vsel %vm506_vm0, %v905_v28, 0.0 }
 0x5ed   : > { %907 = vadd.xlane.f32.xlu2 %v906_v29 }
 0x5ee   : > { %1332 = shalt.err (!%p1329_p8)
}
 0x5ef   : > { %s1421_s30 = smov 128   ;;  %s1422_s19 = smov 8   ;;  %v494_v40 = vld [vmem:[%s1734_s10] sm:$0x1] }
 0x5f0   : > { %1152 = dma.vmem_to_hbm [thread:$0]  (%p1526_p5), %s964_s18, 512, %s966_s28, %s937_s29, %s1421_s30, %s1421_s30, %s1422_s19   ;;  %v927_v44 = vperm.slane %v494_v40, 0 }
 0x5f1   : > { %s1112_s20 = sshll.u32 %s1619_s27, 3  ;;  %s1136_s26 = sshll.u32 %s1509_s25, 3  ;;  %v1224_v41 = vld [vmem:[%s1733_s9] ss:$0 sm:$0xff] }
 0x5f2   : > { %s947_s14 = scalar_lea.hbm %s1735_s11, %s1136_s26  ;;  %s468_s25 = scalar_lea.vmem [#allocation7], %s1112_s20 }
 0x5f3   : > { %s949_s23 = sshll.u32 %s468_s25, 4  ;;  %s951_s15 = sshll.u32 %s947_s14, 4  ;;  %s950_s23 = int_to_ptr.vmem [resolvable:$true] %s949_s23  ;;  %s952_s15 = int_to_ptr.hbm [resolvable:$true] %s951_s15 }
 0x5f4   : > { %s932_s5 = scalar_lea.sflag [#allocation4], %s1619_s27  ;;  %s1347_s30 = sshra.s32 %s952_s15, 4  ;;  %s1348_s30 = int_to_ptr.hbm [resolvable:$true] %s1347_s30 }
 0x5f5   : > { %s1349_s19 = scalar_lea.hbm %s1348_s30, 8  ;;  %s1353_s20 = scalar_lea.hbm %s1735_s11, 16 }
 0x5f6   : > { %p1350_p9 = scmp.ne.s32.totalorder %s1348_s30, %s1349_s19  ;;  %p1354_p12 = scmp.lt.s32.totalorder %s1348_s30, %s1735_s11 }
 0x5f7   : > { %p1355_p13 = scmp.lt.s32.totalorder %s1353_s20, %s1349_s19 }
 0x5f8   : > { %p1351_p10 = pnand %p1350_p9, %p1526_p5 }
 0x5f9   : > { %p1356_p0 = por %p1355_p13, %p1354_p12 }
 0x5fa   : > { %p1352_p11 = pneg %p1351_p10 }
 0x5fc   : > { %p1357_p1 = pnand %p1356_p0, %p1352_p11 }
 0x660   : > { %v908_v30 = vpop.xlane.xlu2 %907 }
 0x661   : > { %v909_v31 = vmul.f32 %v908_v30, %v902_v25 }
 0x663   : > { %v910_v32 = vadd.f32 1e-05, %v909_v31 }
 0x665   : > { %1243 = vrsqrt.f32 %v910_v32  ;;  %vm917_vm7 = vweird.f32 %v910_v32 }
 0x66b   : > { %v1244_v33 = vpop.eup %1243 }
 0x66c   : > { %v912_v35 = vmul.f32 %v1244_v33, %v910_v32  ;;  %vm918_vm6 = vweird.f32 %v1244_v33 }
 0x66d   : > { %vm919_vm8 = vmor %vm917_vm7, %vm918_vm6 }
 0x66e   : > { %v913_v36 = vmul.f32 %v1244_v33, %v912_v35 }
 0x670   : > { %v914_v37 = vmul.f32 0.5, %v913_v36 }
 0x672   : > { %v915_v38 = vsub.f32 1.5, %v914_v37 }
 0x674   : > { %v916_v39 = vmul.f32 %v1244_v33, %v915_v38 }
 0x676   : > { %v920_v42 = vsel %vm919_vm8, %v1244_v33, %v916_v39 }
 0x677   : > { %v921_v43 = vmul.f32 %v920_v42, %v904_v11 }
 0x679   : > { %v925_v45 = vmul.f32 %v1224_v41, %v921_v43 }
 0x67b   : > { %v929_v46 = vadd.f32 %v927_v44, %v925_v45 }
 0x67d   : > { %930 = vst.msk [vmem:[%s468_s25] sm:$0xff] %vm506_vm0, %v929_v46 }
 0x67e   : > { %1360 = shalt.err (!%p1357_p1)
}
 0x67f   : > { %1151 = dma.vmem_to_hbm [thread:$0]  (%p1526_p5), %s950_s23, 128, %s952_s15, %s932_s5  }
 0x680 PF: > { %p1173_p2 = scmp.ge.s32.totalorder %s1407_s24, 2  ;;  %s980_s28 = sand.u32 1, %s1395_s21  }
 0x681   : > { %s981_s29 = scalar_lea.sflag [#allocation4], %s980_s28 }
 0x682   : > { %p1163_p3 = pnand %p1173_p2, %p1530_p6 }
 0x684   : > { %p1164_p4 = pneg %p1163_p3 }
 0x686   : > { %1386 = dma.done.wait (%p1164_p4), %s981_s29, 128  }
 0x687   : > { %1388 = vsyncadd (%p1164_p4), %s981_s29, 4294967168  ;;  %s991_s7 = scalar_lea.sflag [#allocation9], %s980_s28 }
 0x688   : > { %1390 = dma.done.wait (%p1164_p4), %s991_s7, 512  }
 0x689   : > { %1392 = vsyncadd (%p1164_p4), %s991_s7, 4294966784  ;;  %s1753_s24 = sld [smem:[#allocation15_spill]]  ;;  %s1756_s21 = smov %s1399_s22 }
 0x68a   : > { %s1754_s14 = sld [smem:[#allocation14_spill]] }
 0x68b   : > { %s1755_s23 = sld [smem:[#allocation16_spill]] }
 0x68f   : > { %p28_p5 = scmp.ge.s32.totalorder %s1753_s24, 4  }
 0x690   : > { %s1757_s22 = smov %s1754_s14 }
 0x691   :  { %30 = sbr.rel (!%p28_p5) target bundleno = 10 (0xa), region = 134 }
 0x696   :  { %997 = vsyncpa [#allocation3], 1 }
 0x697   :  { %999 = vsyncpa [#allocation3 + $0x1], 1 }
 0x698   :  { %1000 = vsyncpa [#allocation6], 1 }
 0x699   :  { %1001 = vsyncpa [#allocation4], 1 }
 0x69a   :  { %1003 = vsyncpa [#allocation4 + $0x1], 1 }
 0x69b   :  { %1004 = vsyncpa [#allocation9], 1 }
 0x69c   :  { %1006 = vsyncpa [#allocation9 + $0x1], 1 }

</bundles_post_ra>
